<compile_context>
chip_gen: v5e
topology: v5e:2x2
jax: 0.10.0
libtpu: 0.0.40
codegen_flags: <defaults>
</compile_context>

<pallas_src>
import functools

import jax
import jax.numpy as jnp
from jax.experimental import pallas as pl
from jax.experimental.pallas import tpu as pltpu


def _simam_kernel(x_ref, o_ref, *, e_lambda: float, hw: int, approx_recip: bool):
    # x_ref block: (TILE_NC, H*W) -- many (batch, channel) planes, lane-dense.
    x = x_ref[...].astype(jnp.float32)

    inv_hw = 1.0 / float(hw)
    inv_n = 1.0 / float(max(hw - 1, 1))  # hw==1 is degenerate in PyTorch too

    # One streaming pass over x for both statistics (fused reductions).
    s1 = jnp.sum(x, axis=-1, keepdims=True)        # sum(x)         (TILE_NC, 1)
    s2 = jnp.sum(x * x, axis=-1, keepdims=True)    # sum(x^2)       (TILE_NC, 1)
    mean = s1 * inv_hw
    # sum((x-mean)^2) = sum(x^2) - hw*mean^2; clamp against f32 cancellation.
    s = jnp.maximum(s2 - s1 * mean, 0.0)           # (TILE_NC, 1)

    # y = (x-mean)^2 / (4*(s/(hw-1) + e_lambda)) + 0.5   (y >= 0.5)
    inv_denom = 1.0 / (4.0 * (s * inv_n + e_lambda))     # tiny column, exact
    d = x - mean
    y = (d * d) * inv_denom + 0.5

    # sigmoid(y) = 1 / (1 + exp(-y)); exp + reciprocal both land on the EUP.
    sig = pl.reciprocal(1.0 + jnp.exp(-y), approx=approx_recip)
    o_ref[...] = (x * sig).astype(o_ref.dtype)


def _round_up(v: int, m: int) -> int:
    return ((v + m - 1) // m) * m


def simam(x: jax.Array, e_lambda: float = 1e-4) -> jax.Array:
    """SimAM forward pass. x: (N, C, H, W), NCHW like the PyTorch module."""
    n, c, h, w = x.shape
    nc = n * c
    hw = h * w
    itemsize = jnp.dtype(x.dtype).itemsize

    # Sublane-packing multiple for the second-minor block dim.
    row_mult = {4: 8, 2: 16, 1: 32}.get(itemsize, 8)

    # ---- Tile selection: ~2 MiB input block, many grid steps --------------
    target_block_bytes = 2 * 1024 * 1024
    rows_cap = max(
        row_mult,
        (target_block_bytes // max(1, hw * itemsize)) // row_mult * row_mult,
    )
    tile_nc = min(rows_cap, _round_up(nc, row_mult))

    # Aim for >= 8 grid steps when there are enough rows (>=4 per TC on v7x).
    min_steps = 8
    if pl.cdiv(nc, tile_nc) < min_steps and nc > min_steps * row_mult:
        tile_nc = max(row_mult, _round_up(pl.cdiv(nc, min_steps), row_mult))

    # Prefer an even step count so v7x's two TensorCores stay balanced.
    steps = pl.cdiv(nc, tile_nc)
    if steps > 1 and steps % 2 == 1:
        alt = max(row_mult, _round_up(pl.cdiv(nc, steps + 1), row_mult))
        if pl.cdiv(nc, alt) % 2 == 0:
            tile_nc = alt
    grid = pl.cdiv(nc, tile_nc)

    # ---- VMEM footprint & limit (with headroom) ---------------------------
    block_in_bytes = tile_nc * hw * itemsize
    block_f32_bytes = tile_nc * hw * 4
    # Double-buffered in + out blocks, plus ~5 live f32 temporaries in-kernel.
    footprint = 2 * 2 * block_in_bytes + 5 * block_f32_bytes

    try:
        vmem_capacity = int(pltpu.get_tpu_info().vmem_capacity_bytes)
    except Exception:  # pragma: no cover - conservative fallback (v7x = 64 MiB)
        vmem_capacity = 64 * 1024 * 1024
    vmem_budget = int(vmem_capacity * 0.75)

    if footprint > vmem_budget:
        # TODO(synk): for very large planes (a minimum 8-row block overflowing
        # VMEM), add a second grid axis over H*W with a two-pass sum/sumsq
        # scheme instead of falling back to plain XLA.
        return _simam_ref(x, e_lambda)

    vmem_limit = int(min(vmem_budget, max(2 * footprint, 16 * 1024 * 1024)))

    # ---- Flatten to lane-dense (N*C, H*W); no padding, ragged last block --
    # TODO(synk): when H*W << 128 (e.g. 7x7 feature maps) a transposed layout
    # with N*C riding the lane axis would avoid lane-masked vregs.
    x_flat = x.reshape(nc, hw)

    kernel = functools.partial(
        _simam_kernel,
        e_lambda=e_lambda,
        hw=hw,
        approx_recip=(jnp.dtype(x.dtype) != jnp.float32),
    )

    cost = pl.CostEstimate(
        flops=10 * nc * hw,
        transcendentals=nc * hw,                  # exp inside sigmoid
        bytes_accessed=2 * nc * hw * itemsize,    # read + write
    )

    out_flat = pl.pallas_call(
        kernel,
        out_shape=jax.ShapeDtypeStruct((nc, hw), x.dtype),
        grid_spec=pltpu.PrefetchScalarGridSpec(
            num_scalar_prefetch=0,
            grid=(grid,),
            in_specs=[pl.BlockSpec((tile_nc, hw), lambda i: (i, 0))],
            out_specs=pl.BlockSpec((tile_nc, hw), lambda i: (i, 0)),
        ),
        compiler_params=pltpu.CompilerParams(
            dimension_semantics=("parallel",),
            vmem_limit_bytes=vmem_limit,
        ),
        cost_estimate=cost,
    )(x_flat)

    return out_flat.reshape(n, c, h, w)


def _simam_ref(x: jax.Array, e_lambda: float = 1e-4) -> jax.Array:
    """Pure-JAX reference matching the PyTorch module."""
    _, _, h, w = x.shape
    nn_ = w * h - 1
    x32 = x.astype(jnp.float32)
    z = (x32 - jnp.mean(x32, axis=(2, 3), keepdims=True)) ** 2
    y = z / (4.0 * (jnp.sum(z, axis=(2, 3), keepdims=True) / nn_ + e_lambda)) + 0.5
    return (x32 * jax.nn.sigmoid(y)).astype(x.dtype)


if __name__ == "__main__":
    key = jax.random.PRNGKey(0)
    x = jax.random.normal(key, (2, 4, 16, 16), dtype=jnp.float32)

    out = simam(x)
    out = jax.block_until_ready(out)

    ref = _simam_ref(x)
    assert out.shape == x.shape and out.dtype == x.dtype
    assert jnp.allclose(out, ref, atol=1e-5, rtol=1e-5), "mismatch vs reference"

    print("KERNEL_OK")
</pallas_src>

<mosaic_0001>
module attributes {stable_mosaic.version = 11 : i64} {
  func.func @_simam_kernel(%arg0: i32, %arg1: memref<8x256xf32, #tpu.memory_space<vmem>>, %arg2: memref<8x256xf32, #tpu.memory_space<vmem>>) attributes {dimension_semantics = [#tpu.dimension_semantics<parallel>], iteration_bounds = array<i64: 1>, scalar_prefetch = 0 : i64, scratch_operands = 0 : i64, tpu.core_type = #tpu.core_type<tc>, window_params = [{transform_indices = @transform_0, window_bounds = array<i64: 8, 256>}, {transform_indices = @transform_1, window_bounds = array<i64: 8, 256>}]} {
    %c0 = arith.constant 0 : index
    %c0_0 = arith.constant 0 : index
    %0 = vector.load %arg1[%c0, %c0_0] : memref<8x256xf32, #tpu.memory_space<vmem>>, vector<8x256xf32>
    %cst = arith.constant dense<0.000000e+00> : vector<8xf32>
    %1 = vector.multi_reduction <add>, %0, %cst [1] : vector<8x256xf32> to vector<8xf32>
    %2 = vector.shape_cast %1 : vector<8xf32> to vector<8x1xf32>
    %3 = arith.mulf %0, %0 : vector<8x256xf32>
    %cst_1 = arith.constant dense<0.000000e+00> : vector<8xf32>
    %4 = vector.multi_reduction <add>, %3, %cst_1 [1] : vector<8x256xf32> to vector<8xf32>
    %5 = vector.shape_cast %4 : vector<8xf32> to vector<8x1xf32>
    %cst_2 = arith.constant 3.906250e-03 : f32
    %6 = vector.broadcast %cst_2 : f32 to vector<8x1xf32>
    %7 = arith.mulf %2, %6 : vector<8x1xf32>
    %8 = arith.mulf %2, %7 : vector<8x1xf32>
    %9 = arith.subf %5, %8 : vector<8x1xf32>
    %cst_3 = arith.constant 0.000000e+00 : f32
    %10 = vector.broadcast %cst_3 : f32 to vector<8x1xf32>
    %11 = arith.maximumf %9, %10 : vector<8x1xf32>
    %cst_4 = arith.constant 0.00392156886 : f32
    %12 = vector.broadcast %cst_4 : f32 to vector<8x1xf32>
    %13 = arith.mulf %11, %12 : vector<8x1xf32>
    %cst_5 = arith.constant 9.99999974E-5 : f32
    %14 = vector.broadcast %cst_5 : f32 to vector<8x1xf32>
    %15 = arith.addf %13, %14 : vector<8x1xf32>
    %cst_6 = arith.constant 4.000000e+00 : f32
    %16 = vector.broadcast %cst_6 : f32 to vector<8x1xf32>
    %17 = arith.mulf %16, %15 : vector<8x1xf32>
    %cst_7 = arith.constant 1.000000e+00 : f32
    %18 = vector.broadcast %cst_7 : f32 to vector<8x1xf32>
    %19 = arith.divf %18, %17 : vector<8x1xf32>
    %20 = vector.broadcast %7 : vector<8x1xf32> to vector<8x256xf32>
    %21 = arith.subf %0, %20 : vector<8x256xf32>
    %22 = arith.mulf %21, %21 : vector<8x256xf32>
    %23 = vector.broadcast %19 : vector<8x1xf32> to vector<8x256xf32>
    %24 = arith.mulf %22, %23 : vector<8x256xf32>
    %cst_8 = arith.constant 5.000000e-01 : f32
    %25 = vector.broadcast %cst_8 : f32 to vector<8x256xf32>
    %26 = arith.addf %24, %25 : vector<8x256xf32>
    %cst_9 = arith.constant 0.000000e+00 : f32
    %27 = vector.broadcast %cst_9 : f32 to vector<8x256xf32>
    %28 = arith.subf %27, %26 : vector<8x256xf32>
    %29 = math.exp %28 : vector<8x256xf32>
    %cst_10 = arith.constant 1.000000e+00 : f32
    %30 = vector.broadcast %cst_10 : f32 to vector<8x256xf32>
    %31 = arith.addf %30, %29 : vector<8x256xf32>
    %32 = tpu.reciprocal %31 : vector<8x256xf32> -> vector<8x256xf32>
    %33 = arith.mulf %0, %32 : vector<8x256xf32>
    %c0_11 = arith.constant 0 : index
    %c0_12 = arith.constant 0 : index
    %34 = vector.load %arg2[%c0_11, %c0_12] : memref<8x256xf32, #tpu.memory_space<vmem>>, vector<8x256xf32>
    tpu.vector_store %arg2[%c0_11, %c0_12], %33 {strides = array<i32>} : memref<8x256xf32, #tpu.memory_space<vmem>>, vector<8x256xf32>,
    return
  }
  func.func @transform_0(%arg0: i32) -> (i32, i32) {
    %c0_i32 = arith.constant 0 : i32
    %c0_i32_0 = arith.constant 0 : i32
    return %arg0, %c0_i32 : i32, i32
  }
  func.func @transform_1(%arg0: i32) -> (i32, i32) {
    %c0_i32 = arith.constant 0 : i32
    %c0_i32_0 = arith.constant 0 : i32
    return %arg0, %c0_i32 : i32, i32
  }
}

</mosaic_0001>

<bundles_post_ra>
// kernel: tpu_custom_call.1
= control target key start
LH: loop header
LB: loop body
LE: loop exit
PB: predicated region body
PF: predicated region fallthrough
CT: control target
= control target key end

     0   :  { %6 = vsyncpa [#allocation3], 0  ;;  %s216_s0 = inlined_call_operand.hbm [shape: f32[8,256], index: 0, kind: input, shape index: {}]   ;;  %s217_s1 = inlined_call_operand.hbm [shape: f32[8,256], index: 1, kind: output, shape index: {}]  }
   0x1   :  { %7 = vsyncpa [#allocation4], 0  ;;  %s13_s8 = sshll.u32 %s216_s0, 4  ;;  %s184_s9 = smov [#allocation2]   ;;  %s14_s8 = int_to_ptr.hbm [resolvable:$true] %s13_s8 }
   0x2   :  { %s15_s10 = sshll.u32 %s184_s9, 4  ;;  %s16_s10 = int_to_ptr.vmem [resolvable:$true] %s15_s10 }
   0x3   :  { %18 = dma.hbm_to_vmem [thread:$0]  %s14_s8, 256, %s16_s10, [#allocation3]  }
   0x4   :  { %180 = dma.done.wait [#allocation3], 256  }
   0x5   :  { %181 = vsyncadd [#allocation3], 4294967040  ;;  %v199_v0 = vld [vmem:[#allocation2] sm:$0xff]  ;;  %v201_v1 = vld [vmem:[#allocation2 + $0x8] sm:$0xff]  ;;  %s185_s0 = smov [#allocation5]   ;;  %s110_s14 = sshll.u32 %s217_s1, 4  ;;  %s111_s14 = int_to_ptr.hbm [resolvable:$true] %s110_s14 }
   0x6   :  { %v25_v2 = vadd.f32 %v201_v1, %v199_v0  ;;  %v28_v3 = vmul.f32 %v199_v0, %v199_v0  ;;  %v29_v4 = vmul.f32 %v201_v1, %v201_v1  ;;  %s108_s11 = sshll.u32 %s185_s0, 4  ;;  %s109_s11 = int_to_ptr.vmem [resolvable:$true] %s108_s11 }
   0x8   :  { %26 = vadd.xlane.f32.xlu0 %v25_v2  ;;  %v30_v5 = vadd.f32 %v29_v4, %v28_v3 }
  0x10   :  { %31 = vadd.xlane.f32.xlu0 %v30_v5 }
  0x7b   :  { %v27_v6 = vpop.xlane.xlu0 %26 }
  0x7c   :  { %v33_v7 = vmul.f32 0.00390625, %v27_v6 }
  0x7e   :  { %v34_v8 = vmul.f32 %v33_v7, %v27_v6  ;;  %v55_v18 = vsub.f32 %v199_v0, %v33_v7  ;;  %v56_v20 = vsub.f32 %v201_v1, %v33_v7 }
  0x80   :  { %v57_v25 = vmul.f32 %v55_v18, %v55_v18  ;;  %v58_v26 = vmul.f32 %v56_v20, %v56_v20 }
  0x83   :  { %v32_v9 = vpop.xlane.xlu0 %31 }
  0x84   :  { %v35_v10 = vsub.f32 %v32_v9, %v34_v8 }
  0x86   :  { %v36_v11 = vmax.f32 %v35_v10, 0.0 }
  0x88   :  { %v37_v12 = vmul.f32 0.003921569, %v36_v11 }
  0x8a   :  { %v38_v13 = vadd.f32 0.0001, %v37_v12 }
  0x8c   :  { %v39_v14 = vmul.f32 4.0, %v38_v13 }
  0x8e   :  { %122 = vrcp.f32 %v39_v14  ;;  %v51_v19 = vand.u32 2147483648, %v39_v14  ;;  %v49_v22 = vand.u32 2147483647, %v39_v14  ;;  %vm45_vm1 = vweird.f32 %v39_v14 }
  0x90   :  { %v52_v24 = vor.u32 1.1754944e-38, %v51_v19  ;;  %vm50_vm3 = vcmp.eq.f32.partialorder %v49_v22, 8.507059e+37 }
  0x94   :  { %v123_v15 = vpop.eup %122 }
  0x95   :  { %v41_v16 = vmul.f32 %v123_v15, %v39_v14  ;;  %vm46_vm0 = vweird.f32 %v123_v15 }
  0x96   :  { %vm47_vm2 = vmor %vm45_vm1, %vm46_vm0 }
  0x97   :  { %v42_v17 = vsub.f32 1.0, %v41_v16 }
  0x99   :  { %v43_v21 = vmul.f32 %v123_v15, %v42_v17 }
  0x9b   :  { %v44_v23 = vadd.f32 %v123_v15, %v43_v21 }
  0x9d   :  { %v48_v27 = vsel %vm47_vm2, %v123_v15, %v44_v23 }
  0x9e   :  { %v53_v28 = vsel %vm50_vm3, %v52_v24, %v48_v27 }
  0x9f   :  { %v59_v29 = vmul.f32 %v57_v25, %v53_v28  ;;  %v60_v30 = vmul.f32 %v58_v26, %v53_v28 }
  0xa1   :  { %v61_v31 = vadd.f32 0.5, %v59_v29  ;;  %v62_v32 = vadd.f32 0.5, %v60_v30 }
  0xa3   :  { %v63_v33 = vsub.f32 0.0, %v61_v31  ;;  %v64_v34 = vsub.f32 0.0, %v62_v32 }
  0xa5   :  { %v65_v35 = vmul.f32 1.442695, %v63_v33  ;;  %v67_v36 = vmul.f32 1.442695, %v64_v34 }
  0xa7   :  { %124 = vpow2.f32 %v65_v35 }
  0xa8   :  { %126 = vpow2.f32 %v67_v36 }
  0xad   :  { %v125_v37 = vpop.eup %124 }
  0xae   :  { %v127_v38 = vpop.eup %126  ;;  %v69_v39 = vadd.f32 1.0, %v125_v37 }
  0xaf   :  { %v70_v40 = vadd.f32 1.0, %v127_v38 }
  0xb0   :  { %128 = vrcp.f32 %v69_v39  ;;  %v82_v46 = vand.u32 2147483648, %v69_v39  ;;  %v80_v49 = vand.u32 2147483647, %v69_v39  ;;  %vm76_vm6 = vweird.f32 %v69_v39 }
  0xb1   :  { %130 = vrcp.f32 %v70_v40  ;;  %v96_v50 = vand.u32 2147483648, %v70_v40  ;;  %v94_v52 = vand.u32 2147483647, %v70_v40  ;;  %vm90_vm8 = vweird.f32 %v70_v40 }
  0xb2   :  { %v83_v54 = vor.u32 1.1754944e-38, %v82_v46  ;;  %vm81_vm9 = vcmp.eq.f32.partialorder %v80_v49, 8.507059e+37 }
  0xb3   :  { %v97_v57 = vor.u32 1.1754944e-38, %v96_v50  ;;  %vm95_vm11 = vcmp.eq.f32.partialorder %v94_v52, 8.507059e+37 }
  0xb6   :  { %v129_v41 = vpop.eup %128 }
  0xb7   :  { %v131_v42 = vpop.eup %130  ;;  %v72_v43 = vmul.f32 %v129_v41, %v69_v39  ;;  %vm77_vm4 = vweird.f32 %v129_v41 }
  0xb8   :  { %v86_v44 = vmul.f32 %v131_v42, %v70_v40  ;;  %vm91_vm5 = vweird.f32 %v131_v42  ;;  %vm78_vm7 = vmor %vm76_vm6, %vm77_vm4 }
  0xb9   :  { %v73_v45 = vsub.f32 1.0, %v72_v43  ;;  %vm92_vm10 = vmor %vm90_vm8, %vm91_vm5 }
  0xba   :  { %v87_v47 = vsub.f32 1.0, %v86_v44 }
  0xbb   :  { %v74_v48 = vmul.f32 %v129_v41, %v73_v45 }
  0xbc   :  { %v88_v51 = vmul.f32 %v131_v42, %v87_v47 }
  0xbd   :  { %v75_v53 = vadd.f32 %v129_v41, %v74_v48 }
  0xbe   :  { %v89_v55 = vadd.f32 %v131_v42, %v88_v51 }
  0xbf   :  { %v79_v56 = vsel %vm78_vm7, %v129_v41, %v75_v53 }
  0xc0   :  { %v84_v58 = vsel %vm81_vm9, %v83_v54, %v79_v56  ;;  %v93_v59 = vsel %vm92_vm10, %v131_v42, %v89_v55 }
  0xc1   :  { %v98_v60 = vsel %vm95_vm11, %v97_v57, %v93_v59  ;;  %v99_v61 = vmul.f32 %v84_v58, %v199_v0 }
  0xc2   :  { %v100_v62 = vmul.f32 %v98_v60, %v201_v1 }
  0xc3   :  { %101 = vst [vmem:[#allocation5] sm:$0xff] %v99_v61 }
  0xc4   :  { %102 = vst [vmem:[#allocation5 + $0x8] sm:$0xff] %v100_v62 }
  0xc5   :  { %113 = dma.vmem_to_hbm [thread:$0]  %s109_s11, 256, %s111_s14, [#allocation4]  }
  0xc6   :  { %182 = dma.done.wait [#allocation4], 256  }
  0xc7   :  { %183 = vsyncadd [#allocation4], 4294967040 }
  0xc8   :  { %118 = vsyncpa [#allocation3], 1 }
  0xc9   :  { %119 = vsyncpa [#allocation4], 1 }

</bundles_post_ra>
